<compile_context>
chip_gen: v5e
topology: v5e:2x2
jax: 0.10.0
libtpu: 0.0.40
codegen_flags: <defaults>
</compile_context>

<pallas_src>
from functools import partial

import jax
import jax.numpy as jnp
from jax.experimental import pallas as pl
from jax.experimental.pallas import tpu as pltpu

EPS = 1e-5
BC = 8  # batch rows per grid step (f32 sublane count -> aligned row shifts)


# ----------------------------- fused kernel -----------------------------

def generator_kernel(z_ref, wfc_ref, bfc_ref, w1_ref, b1_ref, w2_ref, b2_ref,
                     w3_ref, b3_ref, o_ref):
    Bc = z_ref.shape[0]                       # 8
    L0 = bfc_ref.shape[1] // 128
    M = Bc * L0

    def lrelu(t):
        return jnp.where(t > 0.0, t, 0.2 * t)

    # fc (+ folded BN0) + LeakyReLU. Columns are pre-permuted to (position, channel).
    h = jnp.dot(z_ref[...].astype(jnp.bfloat16), wfc_ref[...],
                preferred_element_type=jnp.float32) + bfc_ref[...]
    h = lrelu(h)                                                     # (Bc, L0*128) f32

    # (Bc, L0*128) -> (L0*Bc, 128): row (l*Bc + b) = batch b, packed position l.
    # All pieces are (8, 128)-aligned, so this is plain vreg copies.
    x = jnp.concatenate([h[:, l * 128:(l + 1) * 128] for l in range(L0)], axis=0)

    def deconv(x, w_ref, b_ref, act):
        # x: (M, 128) f32. Neighbor rows = shift by Bc rows (one packed time position);
        # Bc == 8 keeps shifts whole-sublane-group aligned; zero rows = conv zero-padding
        # and keep batch elements from leaking into each other.
        zero = jnp.zeros((Bc, x.shape[1]), x.dtype)
        prev = jnp.concatenate([zero, x[:M - Bc, :]], axis=0)
        nxt = jnp.concatenate([x[Bc:, :], zero], axis=0)
        # Three accumulated matmuls instead of one matmul on a 3x-wide concat.
        acc = jnp.dot(prev.astype(jnp.bfloat16), w_ref[0],
                      preferred_element_type=jnp.float32)
        acc = acc + jnp.dot(x.astype(jnp.bfloat16), w_ref[1],
                            preferred_element_type=jnp.float32)
        acc = acc + jnp.dot(nxt.astype(jnp.bfloat16), w_ref[2],
                            preferred_element_type=jnp.float32)
        return act(acc + b_ref[...])

    # ConvTranspose1d(128->64,k4,s2,p1)+BN+LReLU : rows become pairs [y(2l)|y(2l+1)]
    x = deconv(x, w1_ref, b1_ref, lrelu)
    # ConvTranspose1d(64->32,k4,s2,p1)+BN+LReLU  : rows become quads [v(4l)..v(4l+3)]
    x = deconv(x, w2_ref, b2_ref, lrelu)
    # ConvTranspose1d(32->nc,k3,s1,p1)+Tanh      : lane-dense (128-wide) store,
    # first 4*nc columns valid, rest zero-padded weight columns.
    o_ref[...] = deconv(x, w3_ref, b3_ref, jnp.tanh)                 # (M, 128)


# ------------------- parameter folding / packing (JAX glue, once) -------------------

def fold_bn_into_affine(w, b, g, beta, mean, var):
    # exact for inference-mode BatchNorm1d
    s = g * jax.lax.rsqrt(var + EPS)
    return w * s, (b - mean) * s + beta


def pack_deconv_taps(w, bias, gin, stride, padding, pad_cols_to=None):
    """Pack ConvTranspose1d taps into a (3, gin*Cin, ncols) weight for 3 matmuls.

    Activation rows hold `gin` consecutive positions (channels-last); the three weight
    groups multiply the previous / current / next row respectively. Each output row
    holds gout = gin*stride positions:
      out[m] = sum_{q,k: stride*q + k - padding = m} x[q] @ w[k]
    """
    K, Cin, Cout = w.shape
    gout = gin * stride
    ncols = gout * Cout
    ncols_pad = max(ncols, pad_cols_to) if pad_cols_to else ncols
    w_big = jnp.zeros((3 * gin, Cin, ncols_pad), w.dtype)
    for p in range(gout):            # output position within the row block
        for k in range(K):           # transposed-conv tap
            num = p + padding - k
            if num % stride:
                continue
            j = num // stride        # input-position offset relative to the row base
            blk = j + gin            # block index inside the 3-row neighborhood
            assert 0 <= blk < 3 * gin
            # .add (not .set): collision-safe for any kernel/stride/padding combo.
            w_big = w_big.at[blk, :, p * Cout:(p + 1) * Cout].add(w[k])
    b_big = jnp.zeros((1, ncols_pad), bias.dtype)
    b_big = b_big.at[0, :ncols].set(jnp.tile(bias, gout))
    # regroup (3*gin, Cin, ncols) -> (3, gin*Cin, ncols): [prev | cur | next] groups.
    w_big = w_big.reshape(3, gin * Cin, ncols_pad)
    return w_big, b_big


def pack_generator_params(p, init_size):
    L0 = init_size
    # fc + BN0 folded; output columns permuted (channel,position) -> (position,channel)
    wfc, bfc = fold_bn_into_affine(p["fc_w"], p["fc_b"], p["bn0_g"], p["bn0_b"],
                                   p["bn0_m"], p["bn0_v"])
    nd = wfc.shape[0]
    wfc = wfc.reshape(nd, 128, L0).transpose(0, 2, 1).reshape(nd, L0 * 128)
    bfc = bfc.reshape(128, L0).T.reshape(1, L0 * 128)

    w1, b1 = fold_bn_into_affine(p["c1_w"], p["c1_b"], p["bn1_g"], p["bn1_b"],
                                 p["bn1_m"], p["bn1_v"])
    w1, b1 = pack_deconv_taps(w1, b1, gin=1, stride=2, padding=1)          # (3,128,128)

    w2, b2 = fold_bn_into_affine(p["c2_w"], p["c2_b"], p["bn2_g"], p["bn2_b"],
                                 p["bn2_m"], p["bn2_v"])
    w2, b2 = pack_deconv_taps(w2, b2, gin=2, stride=2, padding=1)          # (3,128,128)

    # final layer: pad output columns 4*nc -> 128 for lane-dense stores
    w3, b3 = pack_deconv_taps(p["c3_w"], p["c3_b"], gin=4, stride=1, padding=1,
                              pad_cols_to=128)                             # (3,128,128)

    bf = jnp.bfloat16
    return dict(wfc=wfc.astype(bf), bfc=bfc.astype(jnp.float32),
                w1=w1.astype(bf), b1=b1.astype(jnp.float32),
                w2=w2.astype(bf), b2=b2.astype(jnp.float32),
                w3=w3.astype(bf), b3=b3.astype(jnp.float32))


# ----------------------------- forward pass -----------------------------

@partial(jax.jit, static_argnames=("num_channels",))
def generator_forward(z, pk, *, num_channels):
    B, noise_dim = z.shape
    L0 = pk["bfc"].shape[1] // 128
    nc = num_channels

    # pad batch to a multiple of BC (sublane alignment); sliced off after the call.
    B_pad = ((B + BC - 1) // BC) * BC
    if B_pad != B:
        z = jnp.concatenate([z, jnp.zeros((B_pad - B, noise_dim), z.dtype)], axis=0)
    nb = B_pad // BC
    M_step = BC * L0

    def bcast(shape):
        nd = len(shape)
        return pl.BlockSpec(shape, lambda i, nd=nd: (0,) * nd)

    args = (z, pk["wfc"], pk["bfc"], pk["w1"], pk["b1"], pk["w2"], pk["b2"],
            pk["w3"], pk["b3"])
    in_specs = [pl.BlockSpec((BC, noise_dim), lambda i: (i, 0))] + \
               [bcast(a.shape) for a in args[1:]]

    out = pl.pallas_call(
        generator_kernel,
        out_shape=jax.ShapeDtypeStruct((B_pad * L0, 128), jnp.float32),
        grid=(nb,),
        in_specs=in_specs,
        out_specs=pl.BlockSpec((M_step, 128), lambda i: (i, 0)),
        compiler_params=pltpu.CompilerParams(dimension_semantics=("parallel",)),
    )(*args)

    # rows = (step, l, b_local), cols = (p, c) in first 4*nc lanes -> PyTorch NCL.
    y = out[:, :4 * nc].reshape(nb, L0, BC, 4, nc)
    y = y.transpose(0, 2, 4, 1, 3).reshape(B_pad, nc, 4 * L0)
    return y[:B]


# ---------------- pure-JAX reference (PyTorch semantics, eval mode) ----------------

def generator_reference(z, p, init_size):
    HI = jax.lax.Precision.HIGHEST

    def bn(x, g, beta, mean, var):
        return (x - mean) * (g * jax.lax.rsqrt(var + EPS)) + beta

    def lrelu(x):
        return jnp.where(x > 0, x, 0.2 * x)

    def shifts(x):
        Bn, L, Cin = x.shape
        zr = jnp.zeros((Bn, 1, Cin), x.dtype)
        return (jnp.concatenate([zr, x[:, :-1]], axis=1),
                jnp.concatenate([x[:, 1:], zr], axis=1))

    def deconv_s2(x, w, b):          # k=4, s=2, p=1 ; w: (4, Cin, Cout)
        xp, xn = shifts(x)
        even = (jnp.einsum("blc,cd->bld", xp, w[3], precision=HI)
                + jnp.einsum("blc,cd->bld", x, w[1], precision=HI) + b)
        odd = (jnp.einsum("blc,cd->bld", x, w[2], precision=HI)
               + jnp.einsum("blc,cd->bld", xn, w[0], precision=HI) + b)
        Bn, L, Cout = even.shape
        return jnp.stack([even, odd], axis=2).reshape(Bn, 2 * L, Cout)

    def conv_t3(x, w, b):            # k=3, s=1, p=1
        xp, xn = shifts(x)
        return (jnp.einsum("blc,cd->bld", xp, w[2], precision=HI)
                + jnp.einsum("blc,cd->bld", x, w[1], precision=HI)
                + jnp.einsum("blc,cd->bld", xn, w[0], precision=HI) + b)

    h = lrelu(bn(jnp.dot(z, p["fc_w"], precision=HI) + p["fc_b"],
                 p["bn0_g"], p["bn0_b"], p["bn0_m"], p["bn0_v"]))
    x = h.reshape(z.shape[0], 128, init_size).transpose(0, 2, 1)     # (B, L0, 128)
    x = lrelu(bn(deconv_s2(x, p["c1_w"], p["c1_b"]),
                 p["bn1_g"], p["bn1_b"], p["bn1_m"], p["bn1_v"]))
    x = lrelu(bn(deconv_s2(x, p["c2_w"], p["c2_b"]),
                 p["bn2_g"], p["bn2_b"], p["bn2_m"], p["bn2_v"]))
    y = jnp.tanh(conv_t3(x, p["c3_w"], p["c3_b"]))
    return y.transpose(0, 2, 1)                                      # NCL


# ----------------------------- deterministic parameter init -----------------------------

def init_params(key, noise_dim, signal_length, num_channels):
    init_size = signal_length // 4
    F = 128 * init_size
    ks = jax.random.split(key, 16)

    def unif(k, shape, fan_in):
        bound = 1.0 / (fan_in ** 0.5)
        return jax.random.uniform(k, shape, jnp.float32, -bound, bound)

    def bn(k, C):
        k1, k2, k3, k4 = jax.random.split(k, 4)
        return (1.0 + 0.1 * jax.random.normal(k1, (C,), jnp.float32),   # gamma
                0.1 * jax.random.normal(k2, (C,), jnp.float32),         # beta
                0.1 * jax.random.normal(k3, (C,), jnp.float32),         # running_mean
                1.0 + 0.1 * jax.random.uniform(k4, (C,), jnp.float32))  # running_var

    p = {}
    p["fc_w"] = unif(ks[0], (noise_dim, F), noise_dim)
    p["fc_b"] = unif(ks[1], (F,), noise_dim)
    p["bn0_g"], p["bn0_b"], p["bn0_m"], p["bn0_v"] = bn(ks[2], F)
    # ConvTranspose1d weights stored as (K, Cin, Cout)
    p["c1_w"] = unif(ks[3], (4, 128, 64), 128 * 4)
    p["c1_b"] = unif(ks[4], (64,), 128 * 4)
    p["bn1_g"], p["bn1_b"], p["bn1_m"], p["bn1_v"] = bn(ks[5], 64)
    p["c2_w"] = unif(ks[6], (4, 64, 32), 64 * 4)
    p["c2_b"] = unif(ks[7], (32,), 64 * 4)
    p["bn2_g"], p["bn2_b"], p["bn2_m"], p["bn2_v"] = bn(ks[8], 32)
    p["c3_w"] = unif(ks[9], (3, 32, num_channels), 32 * 3)
    p["c3_b"] = unif(ks[10], (num_channels,), 32 * 3)
    return p


# ----------------------------- main -----------------------------

if __name__ == "__main__":
    noise_dim, signal_length, num_channels = 32, 32, 2   # small shapes; L0 = 8
    B = 4
    init_size = signal_length // 4

    key = jax.random.PRNGKey(0)
    kz, kp = jax.random.split(key)
    z = jax.random.normal(kz, (B, noise_dim), jnp.float32)
    params = init_params(kp, noise_dim, signal_length, num_channels)
    packed = pack_generator_params(params, init_size)     # one-time glue (BN fold + tap pack)

    out = generator_forward(z, packed, num_channels=num_channels)
    out = jax.block_until_ready(out)

    assert out.shape == (B, num_channels, signal_length), out.shape
    assert bool(jnp.all(jnp.isfinite(out)))
    assert bool(jnp.all(jnp.abs(out) <= 1.0))             # tanh output range

    ref = generator_reference(z, params, init_size)
    max_err = float(jnp.max(jnp.abs(out - ref)))
    # bf16 matmul inputs (f32 accumulation) vs f32 HIGHEST-precision reference
    assert max_err < 3e-2, f"mismatch vs reference: max_err={max_err}"

    print("KERNEL_OK")
</pallas_src>

<mosaic_0001>
module attributes {stable_mosaic.version = 11 : i64} {
  func.func @generator_kernel(%arg0: i32, %arg1: memref<8x32xf32, #tpu.memory_space<vmem>>, %arg2: memref<32x1024xbf16, #tpu.memory_space<vmem>>, %arg3: memref<1x1024xf32, #tpu.memory_space<vmem>>, %arg4: memref<3x128x128xbf16, #tpu.memory_space<vmem>>, %arg5: memref<1x128xf32, #tpu.memory_space<vmem>>, %arg6: memref<3x128x128xbf16, #tpu.memory_space<vmem>>, %arg7: memref<1x128xf32, #tpu.memory_space<vmem>>, %arg8: memref<3x128x128xbf16, #tpu.memory_space<vmem>>, %arg9: memref<1x128xf32, #tpu.memory_space<vmem>>, %arg10: memref<64x128xf32, #tpu.memory_space<vmem>>) attributes {dimension_semantics = [#tpu.dimension_semantics<parallel>], iteration_bounds = array<i64: 1>, scalar_prefetch = 0 : i64, scratch_operands = 0 : i64, tpu.core_type = #tpu.core_type<tc>, window_params = [{transform_indices = @transform_0, window_bounds = array<i64: 8, 32>}, {pipeline_mode = #tpu.pipeline_mode<synchronous>, transform_indices = @transform_1, window_bounds = array<i64: 32, 1024>}, {pipeline_mode = #tpu.pipeline_mode<synchronous>, transform_indices = @transform_2, window_bounds = array<i64: 1, 1024>}, {pipeline_mode = #tpu.pipeline_mode<synchronous>, transform_indices = @transform_3, window_bounds = array<i64: 3, 128, 128>}, {pipeline_mode = #tpu.pipeline_mode<synchronous>, transform_indices = @transform_4, window_bounds = array<i64: 1, 128>}, {pipeline_mode = #tpu.pipeline_mode<synchronous>, transform_indices = @transform_5, window_bounds = array<i64: 3, 128, 128>}, {pipeline_mode = #tpu.pipeline_mode<synchronous>, transform_indices = @transform_6, window_bounds = array<i64: 1, 128>}, {pipeline_mode = #tpu.pipeline_mode<synchronous>, transform_indices = @transform_7, window_bounds = array<i64: 3, 128, 128>}, {pipeline_mode = #tpu.pipeline_mode<synchronous>, transform_indices = @transform_8, window_bounds = array<i64: 1, 128>}, {transform_indices = @transform_9, window_bounds = array<i64: 64, 128>}]} {
    %c0 = arith.constant 0 : index
    %c0_0 = arith.constant 0 : index
    %0 = vector.load %arg1[%c0, %c0_0] : memref<8x32xf32, #tpu.memory_space<vmem>>, vector<8x32xf32>
    %1 = arith.truncf %0 : vector<8x32xf32> to vector<8x32xbf16>
    %c0_1 = arith.constant 0 : index
    %c0_2 = arith.constant 0 : index
    %2 = vector.load %arg2[%c0_1, %c0_2] : memref<32x1024xbf16, #tpu.memory_space<vmem>>, vector<32x1024xbf16>
    %cst = arith.constant dense<0.000000e+00> : vector<8x1024xf32>
    %3 = tpu.matmul %1, %2, %cst {dimension_numbers = #tpu.dot_dimension_numbers<[1], [0], [0], [1], [0, 0, 1, 1], [], []>} : vector<8x32xbf16>, vector<32x1024xbf16>, vector<8x1024xf32> -> vector<8x1024xf32>
    %c0_3 = arith.constant 0 : index
    %c0_4 = arith.constant 0 : index
    %4 = vector.load %arg3[%c0_3, %c0_4] : memref<1x1024xf32, #tpu.memory_space<vmem>>, vector<1x1024xf32>
    %5 = vector.broadcast %4 : vector<1x1024xf32> to vector<8x1024xf32>
    %6 = arith.addf %3, %5 : vector<8x1024xf32>
    %cst_5 = arith.constant 0.000000e+00 : f32
    %7 = vector.broadcast %cst_5 : f32 to vector<8x1024xf32>
    %8 = arith.cmpf ogt, %6, %7 : vector<8x1024xf32>
    %cst_6 = arith.constant 2.000000e-01 : f32
    %9 = vector.broadcast %cst_6 : f32 to vector<8x1024xf32>
    %10 = arith.mulf %9, %6 : vector<8x1024xf32>
    %11 = arith.select %8, %6, %10 : vector<8x1024xi1>, vector<8x1024xf32>
    %12 = vector.extract_strided_slice %11 {offsets = [0, 0], sizes = [8, 128], strides = [1, 1]} : vector<8x1024xf32> to vector<8x128xf32>
    %13 = vector.extract_strided_slice %11 {offsets = [0, 128], sizes = [8, 128], strides = [1, 1]} : vector<8x1024xf32> to vector<8x128xf32>
    %14 = vector.extract_strided_slice %11 {offsets = [0, 256], sizes = [8, 128], strides = [1, 1]} : vector<8x1024xf32> to vector<8x128xf32>
    %15 = vector.extract_strided_slice %11 {offsets = [0, 384], sizes = [8, 128], strides = [1, 1]} : vector<8x1024xf32> to vector<8x128xf32>
    %16 = vector.extract_strided_slice %11 {offsets = [0, 512], sizes = [8, 128], strides = [1, 1]} : vector<8x1024xf32> to vector<8x128xf32>
    %17 = vector.extract_strided_slice %11 {offsets = [0, 640], sizes = [8, 128], strides = [1, 1]} : vector<8x1024xf32> to vector<8x128xf32>
    %18 = vector.extract_strided_slice %11 {offsets = [0, 768], sizes = [8, 128], strides = [1, 1]} : vector<8x1024xf32> to vector<8x128xf32>
    %19 = vector.extract_strided_slice %11 {offsets = [0, 896], sizes = [8, 128], strides = [1, 1]} : vector<8x1024xf32> to vector<8x128xf32>
    %20 = tpu.concatenate %12, %13, %14, %15, %16, %17, %18, %19 in 0 : vector<8x128xf32>, vector<8x128xf32>, vector<8x128xf32>, vector<8x128xf32>, vector<8x128xf32>, vector<8x128xf32>, vector<8x128xf32>, vector<8x128xf32> -> vector<64x128xf32>
    %cst_7 = arith.constant 0.000000e+00 : f32
    %21 = vector.broadcast %cst_7 : f32 to vector<8x128xf32>
    %22 = vector.extract_strided_slice %20 {offsets = [0, 0], sizes = [56, 128], strides = [1, 1]} : vector<64x128xf32> to vector<56x128xf32>
    %23 = tpu.concatenate %21, %22 in 0 : vector<8x128xf32>, vector<56x128xf32> -> vector<64x128xf32>
    %24 = vector.extract_strided_slice %20 {offsets = [8, 0], sizes = [56, 128], strides = [1, 1]} : vector<64x128xf32> to vector<56x128xf32>
    %25 = tpu.concatenate %24, %21 in 0 : vector<56x128xf32>, vector<8x128xf32> -> vector<64x128xf32>
    %26 = arith.truncf %23 : vector<64x128xf32> to vector<64x128xbf16>
    %c0_8 = arith.constant 0 : index
    %c0_9 = arith.constant 0 : index
    %c0_10 = arith.constant 0 : index
    %27 = vector.load %arg4[%c0_8, %c0_9, %c0_10] : memref<3x128x128xbf16, #tpu.memory_space<vmem>>, vector<1x128x128xbf16>
    %28 = vector.shape_cast %27 : vector<1x128x128xbf16> to vector<128x128xbf16>
    %cst_11 = arith.constant dense<0.000000e+00> : vector<64x128xf32>
    %29 = tpu.matmul %26, %28, %cst_11 {dimension_numbers = #tpu.dot_dimension_numbers<[1], [0], [0], [1], [0, 0, 1, 1], [], []>} : vector<64x128xbf16>, vector<128x128xbf16>, vector<64x128xf32> -> vector<64x128xf32>
    %30 = arith.truncf %20 : vector<64x128xf32> to vector<64x128xbf16>
    %c1 = arith.constant 1 : index
    %c0_12 = arith.constant 0 : index
    %c0_13 = arith.constant 0 : index
    %31 = vector.load %arg4[%c1, %c0_12, %c0_13] : memref<3x128x128xbf16, #tpu.memory_space<vmem>>, vector<1x128x128xbf16>
    %32 = vector.shape_cast %31 : vector<1x128x128xbf16> to vector<128x128xbf16>
    %cst_14 = arith.constant dense<0.000000e+00> : vector<64x128xf32>
    %33 = tpu.matmul %30, %32, %cst_14 {dimension_numbers = #tpu.dot_dimension_numbers<[1], [0], [0], [1], [0, 0, 1, 1], [], []>} : vector<64x128xbf16>, vector<128x128xbf16>, vector<64x128xf32> -> vector<64x128xf32>
    %34 = arith.addf %29, %33 : vector<64x128xf32>
    %35 = arith.truncf %25 : vector<64x128xf32> to vector<64x128xbf16>
    %c2 = arith.constant 2 : index
    %c0_15 = arith.constant 0 : index
    %c0_16 = arith.constant 0 : index
    %36 = vector.load %arg4[%c2, %c0_15, %c0_16] : memref<3x128x128xbf16, #tpu.memory_space<vmem>>, vector<1x128x128xbf16>
    %37 = vector.shape_cast %36 : vector<1x128x128xbf16> to vector<128x128xbf16>
    %cst_17 = arith.constant dense<0.000000e+00> : vector<64x128xf32>
    %38 = tpu.matmul %35, %37, %cst_17 {dimension_numbers = #tpu.dot_dimension_numbers<[1], [0], [0], [1], [0, 0, 1, 1], [], []>} : vector<64x128xbf16>, vector<128x128xbf16>, vector<64x128xf32> -> vector<64x128xf32>
    %39 = arith.addf %34, %38 : vector<64x128xf32>
    %c0_18 = arith.constant 0 : index
    %c0_19 = arith.constant 0 : index
    %40 = vector.load %arg5[%c0_18, %c0_19] : memref<1x128xf32, #tpu.memory_space<vmem>>, vector<1x128xf32>
    %41 = vector.broadcast %40 : vector<1x128xf32> to vector<64x128xf32>
    %42 = arith.addf %39, %41 : vector<64x128xf32>
    %cst_20 = arith.constant 0.000000e+00 : f32
    %43 = vector.broadcast %cst_20 : f32 to vector<64x128xf32>
    %44 = arith.cmpf ogt, %42, %43 : vector<64x128xf32>
    %cst_21 = arith.constant 2.000000e-01 : f32
    %45 = vector.broadcast %cst_21 : f32 to vector<64x128xf32>
    %46 = arith.mulf %45, %42 : vector<64x128xf32>
    %47 = arith.select %44, %42, %46 : vector<64x128xi1>, vector<64x128xf32>
    %cst_22 = arith.constant 0.000000e+00 : f32
    %48 = vector.broadcast %cst_22 : f32 to vector<8x128xf32>
    %49 = vector.extract_strided_slice %47 {offsets = [0, 0], sizes = [56, 128], strides = [1, 1]} : vector<64x128xf32> to vector<56x128xf32>
    %50 = tpu.concatenate %48, %49 in 0 : vector<8x128xf32>, vector<56x128xf32> -> vector<64x128xf32>
    %51 = vector.extract_strided_slice %47 {offsets = [8, 0], sizes = [56, 128], strides = [1, 1]} : vector<64x128xf32> to vector<56x128xf32>
    %52 = tpu.concatenate %51, %48 in 0 : vector<56x128xf32>, vector<8x128xf32> -> vector<64x128xf32>
    %53 = arith.truncf %50 : vector<64x128xf32> to vector<64x128xbf16>
    %c0_23 = arith.constant 0 : index
    %c0_24 = arith.constant 0 : index
    %c0_25 = arith.constant 0 : index
    %54 = vector.load %arg6[%c0_23, %c0_24, %c0_25] : memref<3x128x128xbf16, #tpu.memory_space<vmem>>, vector<1x128x128xbf16>
    %55 = vector.shape_cast %54 : vector<1x128x128xbf16> to vector<128x128xbf16>
    %cst_26 = arith.constant dense<0.000000e+00> : vector<64x128xf32>
    %56 = tpu.matmul %53, %55, %cst_26 {dimension_numbers = #tpu.dot_dimension_numbers<[1], [0], [0], [1], [0, 0, 1, 1], [], []>} : vector<64x128xbf16>, vector<128x128xbf16>, vector<64x128xf32> -> vector<64x128xf32>
    %57 = arith.truncf %47 : vector<64x128xf32> to vector<64x128xbf16>
    %c1_27 = arith.constant 1 : index
    %c0_28 = arith.constant 0 : index
    %c0_29 = arith.constant 0 : index
    %58 = vector.load %arg6[%c1_27, %c0_28, %c0_29] : memref<3x128x128xbf16, #tpu.memory_space<vmem>>, vector<1x128x128xbf16>
    %59 = vector.shape_cast %58 : vector<1x128x128xbf16> to vector<128x128xbf16>
    %cst_30 = arith.constant dense<0.000000e+00> : vector<64x128xf32>
    %60 = tpu.matmul %57, %59, %cst_30 {dimension_numbers = #tpu.dot_dimension_numbers<[1], [0], [0], [1], [0, 0, 1, 1], [], []>} : vector<64x128xbf16>, vector<128x128xbf16>, vector<64x128xf32> -> vector<64x128xf32>
    %61 = arith.addf %56, %60 : vector<64x128xf32>
    %62 = arith.truncf %52 : vector<64x128xf32> to vector<64x128xbf16>
    %c2_31 = arith.constant 2 : index
    %c0_32 = arith.constant 0 : index
    %c0_33 = arith.constant 0 : index
    %63 = vector.load %arg6[%c2_31, %c0_32, %c0_33] : memref<3x128x128xbf16, #tpu.memory_space<vmem>>, vector<1x128x128xbf16>
    %64 = vector.shape_cast %63 : vector<1x128x128xbf16> to vector<128x128xbf16>
    %cst_34 = arith.constant dense<0.000000e+00> : vector<64x128xf32>
    %65 = tpu.matmul %62, %64, %cst_34 {dimension_numbers = #tpu.dot_dimension_numbers<[1], [0], [0], [1], [0, 0, 1, 1], [], []>} : vector<64x128xbf16>, vector<128x128xbf16>, vector<64x128xf32> -> vector<64x128xf32>
    %66 = arith.addf %61, %65 : vector<64x128xf32>
    %c0_35 = arith.constant 0 : index
    %c0_36 = arith.constant 0 : index
    %67 = vector.load %arg7[%c0_35, %c0_36] : memref<1x128xf32, #tpu.memory_space<vmem>>, vector<1x128xf32>
    %68 = vector.broadcast %67 : vector<1x128xf32> to vector<64x128xf32>
    %69 = arith.addf %66, %68 : vector<64x128xf32>
    %cst_37 = arith.constant 0.000000e+00 : f32
    %70 = vector.broadcast %cst_37 : f32 to vector<64x128xf32>
    %71 = arith.cmpf ogt, %69, %70 : vector<64x128xf32>
    %cst_38 = arith.constant 2.000000e-01 : f32
    %72 = vector.broadcast %cst_38 : f32 to vector<64x128xf32>
    %73 = arith.mulf %72, %69 : vector<64x128xf32>
    %74 = arith.select %71, %69, %73 : vector<64x128xi1>, vector<64x128xf32>
    %cst_39 = arith.constant 0.000000e+00 : f32
    %75 = vector.broadcast %cst_39 : f32 to vector<8x128xf32>
    %76 = vector.extract_strided_slice %74 {offsets = [0, 0], sizes = [56, 128], strides = [1, 1]} : vector<64x128xf32> to vector<56x128xf32>
    %77 = tpu.concatenate %75, %76 in 0 : vector<8x128xf32>, vector<56x128xf32> -> vector<64x128xf32>
    %78 = vector.extract_strided_slice %74 {offsets = [8, 0], sizes = [56, 128], strides = [1, 1]} : vector<64x128xf32> to vector<56x128xf32>
    %79 = tpu.concatenate %78, %75 in 0 : vector<56x128xf32>, vector<8x128xf32> -> vector<64x128xf32>
    %80 = arith.truncf %77 : vector<64x128xf32> to vector<64x128xbf16>
    %c0_40 = arith.constant 0 : index
    %c0_41 = arith.constant 0 : index
    %c0_42 = arith.constant 0 : index
    %81 = vector.load %arg8[%c0_40, %c0_41, %c0_42] : memref<3x128x128xbf16, #tpu.memory_space<vmem>>, vector<1x128x128xbf16>
    %82 = vector.shape_cast %81 : vector<1x128x128xbf16> to vector<128x128xbf16>
    %cst_43 = arith.constant dense<0.000000e+00> : vector<64x128xf32>
    %83 = tpu.matmul %80, %82, %cst_43 {dimension_numbers = #tpu.dot_dimension_numbers<[1], [0], [0], [1], [0, 0, 1, 1], [], []>} : vector<64x128xbf16>, vector<128x128xbf16>, vector<64x128xf32> -> vector<64x128xf32>
    %84 = arith.truncf %74 : vector<64x128xf32> to vector<64x128xbf16>
    %c1_44 = arith.constant 1 : index
    %c0_45 = arith.constant 0 : index
    %c0_46 = arith.constant 0 : index
    %85 = vector.load %arg8[%c1_44, %c0_45, %c0_46] : memref<3x128x128xbf16, #tpu.memory_space<vmem>>, vector<1x128x128xbf16>
    %86 = vector.shape_cast %85 : vector<1x128x128xbf16> to vector<128x128xbf16>
    %cst_47 = arith.constant dense<0.000000e+00> : vector<64x128xf32>
    %87 = tpu.matmul %84, %86, %cst_47 {dimension_numbers = #tpu.dot_dimension_numbers<[1], [0], [0], [1], [0, 0, 1, 1], [], []>} : vector<64x128xbf16>, vector<128x128xbf16>, vector<64x128xf32> -> vector<64x128xf32>
    %88 = arith.addf %83, %87 : vector<64x128xf32>
    %89 = arith.truncf %79 : vector<64x128xf32> to vector<64x128xbf16>
    %c2_48 = arith.constant 2 : index
    %c0_49 = arith.constant 0 : index
    %c0_50 = arith.constant 0 : index
    %90 = vector.load %arg8[%c2_48, %c0_49, %c0_50] : memref<3x128x128xbf16, #tpu.memory_space<vmem>>, vector<1x128x128xbf16>
    %91 = vector.shape_cast %90 : vector<1x128x128xbf16> to vector<128x128xbf16>
    %cst_51 = arith.constant dense<0.000000e+00> : vector<64x128xf32>
    %92 = tpu.matmul %89, %91, %cst_51 {dimension_numbers = #tpu.dot_dimension_numbers<[1], [0], [0], [1], [0, 0, 1, 1], [], []>} : vector<64x128xbf16>, vector<128x128xbf16>, vector<64x128xf32> -> vector<64x128xf32>
    %93 = arith.addf %88, %92 : vector<64x128xf32>
    %c0_52 = arith.constant 0 : index
    %c0_53 = arith.constant 0 : index
    %94 = vector.load %arg9[%c0_52, %c0_53] : memref<1x128xf32, #tpu.memory_space<vmem>>, vector<1x128xf32>
    %95 = vector.broadcast %94 : vector<1x128xf32> to vector<64x128xf32>
    %96 = arith.addf %93, %95 : vector<64x128xf32>
    %97 = math.tanh %96 : vector<64x128xf32>
    %c0_54 = arith.constant 0 : index
    %c0_55 = arith.constant 0 : index
    %98 = vector.load %arg10[%c0_54, %c0_55] : memref<64x128xf32, #tpu.memory_space<vmem>>, vector<64x128xf32>
    tpu.vector_store %arg10[%c0_54, %c0_55], %97 {strides = array<i32>} : memref<64x128xf32, #tpu.memory_space<vmem>>, vector<64x128xf32>,
    return
  }
  func.func @transform_0(%arg0: i32) -> (i32, i32) {
    %c0_i32 = arith.constant 0 : i32
    %c0_i32_0 = arith.constant 0 : i32
    return %arg0, %c0_i32 : i32, i32
  }
  func.func @transform_1(%arg0: i32) -> (i32, i32) {
    %c0_i32 = arith.constant 0 : i32
    %c0_i32_0 = arith.constant 0 : i32
    %c0_i32_1 = arith.constant 0 : i32
    return %c0_i32, %c0_i32_0 : i32, i32
  }
  func.func @transform_2(%arg0: i32) -> (i32, i32) {
    %c0_i32 = arith.constant 0 : i32
    %c0_i32_0 = arith.constant 0 : i32
    %c0_i32_1 = arith.constant 0 : i32
    return %c0_i32, %c0_i32_0 : i32, i32
  }
  func.func @transform_3(%arg0: i32) -> (i32, i32, i32) {
    %c0_i32 = arith.constant 0 : i32
    %c0_i32_0 = arith.constant 0 : i32
    %c0_i32_1 = arith.constant 0 : i32
    %c0_i32_2 = arith.constant 0 : i32
    return %c0_i32, %c0_i32_0, %c0_i32_1 : i32, i32, i32
  }
  func.func @transform_4(%arg0: i32) -> (i32, i32) {
    %c0_i32 = arith.constant 0 : i32
    %c0_i32_0 = arith.constant 0 : i32
    %c0_i32_1 = arith.constant 0 : i32
    return %c0_i32, %c0_i32_0 : i32, i32
  }
  func.func @transform_5(%arg0: i32) -> (i32, i32, i32) {
    %c0_i32 = arith.constant 0 : i32
    %c0_i32_0 = arith.constant 0 : i32
    %c0_i32_1 = arith.constant 0 : i32
    %c0_i32_2 = arith.constant 0 : i32
    return %c0_i32, %c0_i32_0, %c0_i32_1 : i32, i32, i32
  }
  func.func @transform_6(%arg0: i32) -> (i32, i32) {
    %c0_i32 = arith.constant 0 : i32
    %c0_i32_0 = arith.constant 0 : i32
    %c0_i32_1 = arith.constant 0 : i32
    return %c0_i32, %c0_i32_0 : i32, i32
  }
  func.func @transform_7(%arg0: i32) -> (i32, i32, i32) {
    %c0_i32 = arith.constant 0 : i32
    %c0_i32_0 = arith.constant 0 : i32
    %c0_i32_1 = arith.constant 0 : i32
    %c0_i32_2 = arith.constant 0 : i32
    return %c0_i32, %c0_i32_0, %c0_i32_1 : i32, i32, i32
  }
  func.func @transform_8(%arg0: i32) -> (i32, i32) {
    %c0_i32 = arith.constant 0 : i32
    %c0_i32_0 = arith.constant 0 : i32
    %c0_i32_1 = arith.constant 0 : i32
    return %c0_i32, %c0_i32_0 : i32, i32
  }
  func.func @transform_9(%arg0: i32) -> (i32, i32) {
    %c0_i32 = arith.constant 0 : i32
    %c0_i32_0 = arith.constant 0 : i32
    return %arg0, %c0_i32 : i32, i32
  }
}

</mosaic_0001>

<bundles_post_ra>
// kernel: generator_forward.1
= control target key start
LH: loop header
LB: loop body
LE: loop exit
PB: predicated region body
PF: predicated region fallthrough
CT: control target
= control target key end

     0   :  { %14 = vsyncpa [#allocation3], 0  ;;  %s2114_s0 = inlined_call_operand.vmem [shape: f32[8,32], index: 0, kind: input, shape index: {}]   ;;  %s2115_s1 = inlined_call_operand.hbm [shape: bf16[32,1024], index: 1, kind: input, shape index: {}]   ;;  %s2116_s2 = inlined_call_operand.vmem [shape: f32[1,1024], index: 2, kind: input, shape index: {}]   ;;  %s2117_s3 = inlined_call_operand.hbm [shape: bf16[3,128,128], index: 3, kind: input, shape index: {}]   ;;  %s2118_s4 = inlined_call_operand.vmem [shape: f32[1,128], index: 4, kind: input, shape index: {}]   ;;  %s2119_s5 = inlined_call_operand.hbm [shape: bf16[3,128,128], index: 5, kind: input, shape index: {}]   ;;  %s2120_s6 = inlined_call_operand.vmem [shape: f32[1,128], index: 6, kind: input, shape index: {}]   ;;  %s2121_s7 = inlined_call_operand.hbm [shape: bf16[3,128,128], index: 7, kind: input, shape index: {}]   ;;  %s2122_s8 = inlined_call_operand.vmem [shape: f32[1,128], index: 8, kind: input, shape index: {}]   ;;  %s2123_s9 = inlined_call_operand.vmem [shape: f32[64,128], index: 9, kind: output, shape index: {}]  }
   0x1   :  { %15 = vsyncpa [#allocation5], 0  ;;  %s38_s11 = sshll.u32 %s2117_s3, 4  ;;  %s39_s11 = int_to_ptr.hbm [resolvable:$true] %s38_s11 }
   0x2   :  { %16 = vsyncpa [#allocation8], 0  ;;  %s1931_s12 = smov [#allocation4]   ;;  %s23_s16 = sshll.u32 %s2115_s1, 4  ;;  %s24_s16 = int_to_ptr.hbm [resolvable:$true] %s23_s16 }
   0x3   :  { %s40_s13 = sshll.u32 %s1931_s12, 4  ;;  %s1932_s17 = smov 64   ;;  %s41_s13 = int_to_ptr.vmem [resolvable:$true] %s40_s13 }
   0x4   :  { %s1933_s18 = smov 4   ;;  %s1934_s19 = smov [#allocation2]  }
   0x5   :  { %46 = dma.hbm_to_vmem [thread:$0]  %s39_s11, 3072, %s41_s13, [#allocation5], %s1932_s17, %s1932_s17, %s1933_s18  }
   0x6   :  { %s25_s20 = sshll.u32 %s1934_s19, 4  ;;  %s1935_s21 = smov 512   ;;  %s26_s20 = int_to_ptr.vmem [resolvable:$true] %s25_s20 }
   0x7   :  { %s1936_s22 = smov 32   ;;  %s53_s24 = sshll.u32 %s2119_s5, 4  ;;  %s54_s24 = int_to_ptr.hbm [resolvable:$true] %s53_s24 }
   0x8   :  { %31 = dma.hbm_to_vmem [thread:$0]  %s24_s16, 2048, %s26_s20, [#allocation3], %s1935_s21, %s1935_s21, %s1936_s22  }
   0x9   :  { %s1937_s25 = smov [#allocation6]   ;;  %s68_s28 = sshll.u32 %s2121_s7, 4  ;;  %s69_s28 = int_to_ptr.hbm [resolvable:$true] %s68_s28 }
   0xa   :  { %s55_s26 = sshll.u32 %s1937_s25, 4  ;;  %s1938_s29 = smov [#allocation7]   ;;  %s56_s26 = int_to_ptr.vmem [resolvable:$true] %s55_s26 }
   0xb   :  { %61 = dma.hbm_to_vmem [thread:$0]  %s54_s24, 3072, %s56_s26, [#allocation5], %s1932_s17, %s1932_s17, %s1933_s18  }
   0xc   :  { %s70_s30 = sshll.u32 %s1938_s29, 4  ;;  %s71_s30 = int_to_ptr.vmem [resolvable:$true] %s70_s30 }
   0xd   :  { %76 = dma.hbm_to_vmem [thread:$0]  %s69_s28, 3072, %s71_s30, [#allocation8], %s1932_s17, %s1932_s17, %s1933_s18  }
   0xe   :  { %1925 = dma.done.wait [#allocation3], 2048  }
   0xf   :  { %1926 = vsyncadd [#allocation3], 4294965248 }
  0x10   :  { %1927 = dma.done.wait [#allocation5], 6144  }
  0x11   :  { %1928 = vsyncadd [#allocation5], 4294961152 }
  0x12   :  { %1929 = dma.done.wait [#allocation8], 3072  }
  0x13   :  { %1930 = vsyncadd [#allocation8], 4294964224  ;;  %v1379_v0 = vld [vmem:[#allocation2 + $0x40] sm:$0xf]  ;;  %v1713_v2 = vld [vmem:[#allocation2 + $0x44] sm:$0xf] }
  0x14   :  { %v1717_v1 = vld [vmem:[#allocation2 + $0x5c] sm:$0xf0]  ;;  %v1381_v4 = vld [vmem:[#allocation2 + $0x60] sm:$0xf0]  ;;  %vm212_vm0 = vcmask 261120   ;;  %v1736_v46 = vld [vmem:[#allocation4 + $0x78] sm:$0xff] }
  0x15   :  { %v1380_v3 = vor.u32 %v1717_v1, %v1379_v0  ;;  %v1347_v5 = vld [vmem:[#allocation2] sm:$0xf]  ;;  %v1384_v7 = vor.u32 %v1713_v2, %v1381_v4  ;;  %v1705_v8 = vld [vmem:[#allocation2 + $0x4] sm:$0xf]  ;;  %v1387_v12 = vld [vmem:[#allocation2 + $0x48] sm:$0xf] }
  0x16   :  { %v1709_v6 = vld [vmem:[#allocation2 + $0x1c] sm:$0xf0]  ;;  %v1349_v9 = vld [vmem:[#allocation2 + $0x20] sm:$0xf0]  ;;  %v1718_v13 = vld [vmem:[#allocation2 + $0x64] sm:$0xf0] }
  0x17   :  { %v96_v10 = vld [vmem:[%s2114_s0] sm:$0xff]  ;;  %222 = vmatpush.bf16.msra.mxu2 %v1380_v3  ;;  %v1348_v11 = vor.u32 %v1709_v6, %v1347_v5  ;;  %v1714_v14 = vld [vmem:[#allocation2 + $0x4c] sm:$0xf]  ;;  %235 = vmatpush.bf16.msra.mxu3 %v1384_v7  ;;  %v1352_v15 = vor.u32 %v1705_v8, %v1349_v9  ;;  %v1388_v16 = vor.u32 %v1718_v13, %v1387_v12  ;;  %v1395_v18 = vld [vmem:[#allocation2 + $0x50] sm:$0xf] }
  0x18   :  { %v1389_v17 = vld [vmem:[#allocation2 + $0x68] sm:$0xf0]  ;;  %v1719_v19 = vld [vmem:[#allocation2 + $0x6c] sm:$0xf0]  ;;  %v1715_v22 = vld [vmem:[#allocation2 + $0x54] sm:$0xf]  ;;  %v2005_v25 = vpack.c.bf16 %v96_v10, %v96_v10 }
  0x19   :  { %v1392_v20 = vor.u32 %v1714_v14, %v1389_v17  ;;  %v1396_v21 = vor.u32 %v1719_v19, %v1395_v18  ;;  %v1397_v23 = vld [vmem:[#allocation2 + $0x70] sm:$0xf0]  ;;  %v1355_v24 = vld [vmem:[#allocation2 + $0x8] sm:$0xf]  ;;  %v1706_v28 = vld [vmem:[#allocation2 + $0xc] sm:$0xf] }
  0x1a   :  { %v1400_v26 = vor.u32 %v1715_v22, %v1397_v23  ;;  %v1710_v27 = vld [vmem:[#allocation2 + $0x24] sm:$0xf0]  ;;  %v1357_v29 = vld [vmem:[#allocation2 + $0x28] sm:$0xf0]  ;;  %v1363_v30 = vld [vmem:[#allocation2 + $0x10] sm:$0xf] }
  0x1b   :  { %223 = vmatpush.bf16.msra.mxu2 %v1348_v11  ;;  %274 = vmatpush.bf16.msra.mxu0 %v1396_v21  ;;  %v1711_v31 = vld [vmem:[#allocation2 + $0x2c] sm:$0xf0]  ;;  %v1707_v32 = vld [vmem:[#allocation2 + $0x14] sm:$0xf]  ;;  %v1356_v33 = vor.u32 %v1710_v27, %v1355_v24  ;;  %v1403_v36 = vld [vmem:[#allocation2 + $0x58] sm:$0xf]  ;;  %v1360_v38 = vor.u32 %v1706_v28, %v1357_v29 }
  0x1c   :  { %236 = vmatpush.bf16.msra.mxu3 %v1352_v15  ;;  %v1364_v34 = vor.u32 %v1711_v31, %v1363_v30  ;;  %v1365_v35 = vld [vmem:[#allocation2 + $0x30] sm:$0xf0]  ;;  %v1720_v37 = vld [vmem:[#allocation2 + $0x74] sm:$0xf0]  ;;  %287 = vmatpush.bf16.msra.mxu1 %v1400_v26  ;;  %v1716_v40 = vld [vmem:[#allocation2 + $0x5c] sm:$0xf] }
  0x1d   :  { %v1368_v39 = vor.u32 %v1707_v32, %v1365_v35  ;;  %v1405_v41 = vld [vmem:[#allocation2 + $0x78] sm:$0xf0]  ;;  %v1404_v42 = vor.u32 %v1720_v37, %v1403_v36  ;;  %v1371_v44 = vld [vmem:[#allocation2 + $0x18] sm:$0xf]  ;;  %v1735_v51 = vld [vmem:[#allocation4 + $0x70] sm:$0xff] }
  0x1e   :  { %1409 = vmatmul.msk.bf16.vlgmr.msra.gmra.mxu2 %vm212_vm0, %v2005_v25  ;;  %v1408_v43 = vor.u32 %v1716_v40, %v1405_v41  ;;  %v1712_v45 = vld [vmem:[#allocation2 + $0x34] sm:$0xf0]  ;;  %v1708_v47 = vld [vmem:[#allocation2 + $0x1c] sm:$0xf]  ;;  %v1734_v52 = vld [vmem:[#allocation4 + $0x68] sm:$0xff] }
  0x1f   :  { %248 = vmatpush.bf16.msrb.mxu2 %v1388_v16  ;;  %1410 = vmatmul.msk.bf16.vlgmr.msra.gmra.mxu3 %vm212_vm0, %v2005_v25  ;;  %v1373_v48 = vld [vmem:[#allocation2 + $0x38] sm:$0xf0]  ;;  %v1372_v49 = vor.u32 %v1712_v45, %v1371_v44  ;;  %v1733_v53 = vld [vmem:[#allocation4 + $0x60] sm:$0xff]  ;;  %v1743_v56 = vld [vmem:[#allocation4 + $0xb0] sm:$0xff] }
  0x20   :  { %261 = vmatpush.bf16.msrb.mxu3 %v1392_v20  ;;  %275 = vmatpush.bf16.msra.mxu0 %v1364_v34  ;;  %v1376_v50 = vor.u32 %v1708_v47, %v1373_v48  ;;  %v1744_v54 = vld [vmem:[#allocation4 + $0xb8] sm:$0xff]  ;;  %v1731_v57 = vld [vmem:[#allocation4 + $0x50] sm:$0xff]  ;;  %v1730_v58 = vld [vmem:[#allocation4 + $0x48] sm:$0xff] }
  0x21   :  { %288 = vmatpush.bf16.msra.mxu1 %v1368_v39  ;;  %v1732_v55 = vld [vmem:[#allocation4 + $0x58] sm:$0xff]  ;;  %v1742_v59 = vld [vmem:[#allocation4 + $0xa8] sm:$0xff]  ;;  %v1729_v60 = vld [vmem:[#allocation4 + $0x40] sm:$0xff] }
  0x22   :  { %v1741_v61 = vld [vmem:[#allocation4 + $0xa0] sm:$0xff]  ;;  %v1740_v62 = vld [vmem:[#allocation4 + $0x98] sm:$0xff]  ;;  %v1739_v63 = vld [vmem:[#allocation4 + $0x90] sm:$0xff] }
  0x23   :  { %249 = vmatpush.bf16.msrb.mxu2 %v1356_v33  ;;  %1413 = vmatmul.msk.bf16.vlgmr.msra.gmra.mxu0 %vm212_vm0, %v2005_v25  ;;  %v1738_v0 = vld [vmem:[#allocation4 + $0x88] sm:$0xff]  ;;  %v1737_v1 = vld [vmem:[#allocation4 + $0x80] sm:$0xff]  ;;  %v1728_v2 = vld [vmem:[#allocation4 + $0x38] sm:$0xff] }
  0x24   :  { %262 = vmatpush.bf16.msrb.mxu3 %v1360_v38  ;;  %433 = vmatpush.bf16.msrb.mxu0 %v1736_v46  ;;  %v2026_v3 = vld [vmem:[%s2116_s2] sm:$0xff]  ;;  %v1727_v4 = vld [vmem:[#allocation4 + $0x30] sm:$0xff]  ;;  %v1726_v13 = vld [vmem:[#allocation4 + $0x28] sm:$0xff] }
  0x25   :  { %1414 = vmatmul.msk.bf16.vlgmr.msra.gmra.mxu1 %vm212_vm0, %v2005_v25  ;;  %v120_v5 = vperm.slane %v2026_v3, 4  ;;  %v116_v6 = vperm.slane %v2026_v3, 0  ;;  %v121_v7 = vperm.slane %v2026_v3, 5  ;;  %v117_v8 = vperm.slane %v2026_v3, 1  ;;  %v1725_v23 = vld [vmem:[#allocation4 + $0x20] sm:$0xff]  ;;  %v1724_v32 = vld [vmem:[#allocation4 + $0x18] sm:$0xff] }
  0x26   :  { %1793 = vmatpush.bf16.msrb.mxu1 %v1736_v46  ;;  %v1723_v34 = vld [vmem:[#allocation4 + $0x10] sm:$0xff]  ;;  %v118_v35 = vperm.slane %v2026_v3, 2  ;;  %v119_v36 = vperm.slane %v2026_v3, 3  ;;  %v1722_v37 = vld [vmem:[#allocation4 + $0x8] sm:$0xff] }
  0x27   :  { %300 = vmatpush.bf16.msra.mxu2 %v1404_v42  ;;  %v1721_v42 = vld [vmem:[#allocation4] sm:$0xff] }
  0x28   :  { %313 = vmatpush.bf16.msra.mxu3 %v1408_v43  ;;  %434 = vmatpush.bf16.msrb.mxu0 %v1735_v51 }
  0x2a   :  { %1794 = vmatpush.bf16.msrb.mxu1 %v1735_v51  ;;  %v122_v51 = vperm.slane %v2026_v3, 6 }
  0x2b   :  { %301 = vmatpush.bf16.msra.mxu2 %v1372_v49 }
  0x2c   :  { %314 = vmatpush.bf16.msra.mxu3 %v1376_v50  ;;  %435 = vmatpush.bf16.msrb.mxu0 %v1734_v52 }
  0x2e   :  { %1795 = vmatpush.bf16.msrb.mxu1 %v1734_v52  ;;  %1411 = vmatmul.msk.bf16.vlgmr.msrb.gmra.mxu2 %vm212_vm0, %v2005_v25  ;;  %v123_v52 = vperm.slane %v2026_v3, 7 }
  0x2f   :  { %1412 = vmatmul.msk.bf16.vlgmr.msrb.gmra.mxu3 %vm212_vm0, %v2005_v25  ;;  %605 = vmatpush.bf16.msrb.mxu2 %v1744_v54 }
  0x30   :  { %436 = vmatpush.bf16.msrb.mxu0 %v1733_v53 }
  0x32   :  { %1796 = vmatpush.bf16.msrb.mxu1 %v1733_v53 }
  0x33   :  { %606 = vmatpush.bf16.msrb.mxu2 %v1743_v56 }
  0x34   :  { %437 = vmatpush.bf16.msrb.mxu0 %v1732_v55 }
  0x36   :  { %1797 = vmatpush.bf16.msrb.mxu1 %v1732_v55 }
  0x37   :  { %607 = vmatpush.bf16.msrb.mxu2 %v1742_v59 }
  0x38   :  { %438 = vmatpush.bf16.msrb.mxu0 %v1731_v57 }
  0x3a   :  { %1798 = vmatpush.bf16.msrb.mxu1 %v1731_v57 }
  0x3b   :  { %608 = vmatpush.bf16.msrb.mxu2 %v1741_v61 }
  0x3c   :  { %439 = vmatpush.bf16.msrb.mxu0 %v1730_v58 }
  0x3e   :  { %1415 = vmatmul.msk.bf16.vlgmr.msra.gmra.mxu2 %vm212_vm0, %v2005_v25  ;;  %1799 = vmatpush.bf16.msrb.mxu1 %v1730_v58 }
  0x3f   :  { %1416 = vmatmul.msk.bf16.vlgmr.msra.gmra.mxu3 %vm212_vm0, %v2005_v25  ;;  %609 = vmatpush.bf16.msrb.mxu2 %v1740_v62 }
  0x40   :  { %440 = vmatpush.bf16.msrb.mxu0 %v1729_v60 }
  0x42   :  { %1800 = vmatpush.bf16.msrb.mxu1 %v1729_v60 }
  0x43   :  { %610 = vmatpush.bf16.msrb.mxu2 %v1739_v63 }
  0x46   :  { %510 = vmatpush.bf16.msra.mxu1 %v1728_v2  ;;  %v1939_v2 = vmov 0.0  }
  0x47   :  { %611 = vmatpush.bf16.msrb.mxu2 %v1738_v0 }
  0x4a   :  { %511 = vmatpush.bf16.msra.mxu1 %v1727_v4 }
  0x4b   :  { %612 = vmatpush.bf16.msrb.mxu2 %v1737_v1 }
  0x4e   :  { %512 = vmatpush.bf16.msra.mxu1 %v1726_v13  ;;  %v1759_v13 = vld [vmem:[#allocation6 + $0x70] sm:$0xff] }
  0x52   :  { %513 = vmatpush.bf16.msra.mxu1 %v1725_v23  ;;  %v1763_v23 = vld [vmem:[#allocation6 + $0x90] sm:$0xff] }
  0x56   :  { %514 = vmatpush.bf16.msra.mxu1 %v1724_v32  ;;  %v1761_v32 = vld [vmem:[#allocation6 + $0x80] sm:$0xff] }
  0x5a   :  { %515 = vmatpush.bf16.msra.mxu1 %v1723_v34 }
  0x5e   :  { %516 = vmatpush.bf16.msra.mxu1 %v1722_v37 }
  0x62   :  { %517 = vmatpush.bf16.msra.mxu1 %v1721_v42 }
  0xa0   :  { %v277_v9 = vpop.f32.mrf.mxu0 }
  0xa1   :  { %v278_v10 = vadd.f32 %v277_v9, %v120_v5  ;;  %v225_v11 = vpop.f32.mrf.mxu2  ;;  %v1768_v5 = vld [vmem:[#allocation6 + $0xb8] sm:$0xff]  ;;  %v1751_v9 = vld [vmem:[#allocation6 + $0x30] sm:$0xff] }
  0xa2   :  { %v290_v12 = vpop.f32.mrf.mxu1  ;;  %v226_v14 = vadd.f32 %v225_v11, %v116_v6  ;;  %v238_v15 = vpop.f32.mrf.mxu3  ;;  %v1767_v6 = vld [vmem:[#allocation6 + $0xb0] sm:$0xff]  ;;  %v1760_v11 = vld [vmem:[#allocation6 + $0x78] sm:$0xff] }
  0xa3   :  { %vm324_vm1 = vcmp.gt.f32.partialorder %v278_v10, 0.0  ;;  %v332_v16 = vmul.f32 0.2, %v278_v10  ;;  %v291_v17 = vadd.f32 %v290_v12, %v121_v7  ;;  %v239_v18 = vadd.f32 %v238_v15, %v117_v8  ;;  %v1766_v7 = vld [vmem:[#allocation6 + $0xa8] sm:$0xff]  ;;  %v1752_v8 = vld [vmem:[#allocation6 + $0x38] sm:$0xff]  ;;  %767 = vmatpush.bf16.msrb.mxu3 %v1760_v11 }
  0xa4   :  { %vm320_vm2 = vcmp.gt.f32.partialorder %v226_v14, 0.0  ;;  %v328_v19 = vmul.f32 0.2, %v226_v14  ;;  %844 = vmatpush.bf16.msra.mxu0 %v1752_v8  ;;  %v1750_v12 = vld [vmem:[#allocation6 + $0x28] sm:$0xff]  ;;  %v1764_v15 = vld [vmem:[#allocation6 + $0x98] sm:$0xff] }
  0xa5   :  { %vm325_vm3 = vcmp.gt.f32.partialorder %v291_v17, 0.0  ;;  %v333_v20 = vmul.f32 0.2, %v291_v17  ;;  %vm321_vm4 = vcmp.gt.f32.partialorder %v239_v18, 0.0  ;;  %v329_v21 = vmul.f32 0.2, %v239_v18 }
  0xa6   :  { %v340_v22 = vsel %vm324_vm1, %v278_v10, %v332_v16  ;;  %v336_v24 = vsel %vm320_vm2, %v226_v14, %v328_v19  ;;  %v1765_v10 = vld [vmem:[#allocation6 + $0xa0] sm:$0xff]  ;;  %v1758_v16 = vld [vmem:[#allocation6 + $0x68] sm:$0xff] }
  0xa7   :  { %v341_v25 = vsel %vm325_vm3, %v291_v17, %v333_v20  ;;  %v337_v26 = vsel %vm321_vm4, %v239_v18, %v329_v21  ;;  %v344_v3 = vpack.c.bf16 %v336_v24, %v1939_v2  ;;  %v1749_v14 = vld [vmem:[#allocation6 + $0x20] sm:$0xff]  ;;  %768 = vmatpush.bf16.msrb.mxu3 %v1759_v13  ;;  %v1748_v17 = vld [vmem:[#allocation6 + $0x18] sm:$0xff]  ;;  %v1747_v20 = vld [vmem:[#allocation6 + $0x10] sm:$0xff] }
  0xa8   :  { %v366_v27 = vpack.c.bf16 %v341_v25, %v340_v22  ;;  %v279_v28 = vpop.f32.mrf.mxu0  ;;  %v364_v29 = vpack.c.bf16 %v337_v26, %v336_v24  ;;  %845 = vmatpush.bf16.msra.mxu0 %v1751_v9  ;;  %v1757_v19 = vld [vmem:[#allocation6 + $0x60] sm:$0xff]  ;;  %v1756_v21 = vld [vmem:[#allocation6 + $0x58] sm:$0xff]  ;;  %v1755_v24 = vld [vmem:[#allocation6 + $0x50] sm:$0xff] }
  0xa9   :  { %v227_v30 = vpop.f32.mrf.mxu2  ;;  %v1762_v28 = vld [vmem:[#allocation6 + $0x88] sm:$0xff] }
  0xaa   :  { %451 = vmatmul.bf16.vlgmr.msrb.gmra.mxu1 %v366_v27  ;;  %v292_v31 = vpop.f32.mrf.mxu1  ;;  %v240_v33 = vpop.f32.mrf.mxu3  ;;  %441 = vmatmul.bf16.vlgmr.msrb.gmra.mxu0 %v364_v29  ;;  %v1754_v27 = vld [vmem:[#allocation6 + $0x48] sm:$0xff]  ;;  %v1753_v29 = vld [vmem:[#allocation6 + $0x40] sm:$0xff] }
  0xab   :  { %939 = vmatpush.bf16.msrb.mxu1 %v1768_v5  ;;  %769 = vmatpush.bf16.msrb.mxu3 %v1758_v16 }
  0xac   :  { %846 = vmatpush.bf16.msra.mxu0 %v1750_v12 }
  0xaf   :  { %940 = vmatpush.bf16.msrb.mxu1 %v1767_v6  ;;  %770 = vmatpush.bf16.msrb.mxu3 %v1757_v19 }
  0xb0   :  { %847 = vmatpush.bf16.msra.mxu0 %v1749_v14 }
  0xb1   :  { %v251_v38 = vpop.f32.mrf.mxu2 }
  0xb2   :  { %v252_v39 = vadd.f32 %v251_v38, %v118_v35  ;;  %v264_v40 = vpop.f32.mrf.mxu3  ;;  %v2048_v38 = vld [vmem:[%s2118_s4] ss:$0 sm:$0xff] }
  0xb3   :  { %v265_v41 = vadd.f32 %v264_v40, %v119_v36  ;;  %941 = vmatpush.bf16.msrb.mxu1 %v1766_v7  ;;  %771 = vmatpush.bf16.msrb.mxu3 %v1756_v21  ;;  %v1776_v21 = vld [vmem:[#allocation7 + $0x38] sm:$0xff] }
  0xb4   :  { %v330_v43 = vmul.f32 0.2, %v252_v39  ;;  %vm322_vm5 = vcmp.gt.f32.partialorder %v252_v39, 0.0  ;;  %848 = vmatpush.bf16.msra.mxu0 %v1748_v17 }
  0xb5   :  { %v331_v44 = vmul.f32 0.2, %v265_v41  ;;  %vm323_vm6 = vcmp.gt.f32.partialorder %v265_v41, 0.0 }
  0xb6   :  { %v338_v45 = vsel %vm322_vm5, %v252_v39, %v330_v43 }
  0xb7   :  { %v339_v46 = vsel %vm323_vm6, %v265_v41, %v331_v44  ;;  %v345_v47 = vpack.c.bf16 %v338_v45, %v337_v26  ;;  %942 = vmatpush.bf16.msrb.mxu1 %v1765_v10  ;;  %772 = vmatpush.bf16.msrb.mxu3 %v1755_v24  ;;  %v1775_v24 = vld [vmem:[#allocation7 + $0x30] sm:$0xff] }
  0xb8   :  { %v365_v48 = vpack.c.bf16 %v339_v46, %v338_v45  ;;  %v346_v61 = vpack.c.bf16 %v340_v22, %v339_v46  ;;  %849 = vmatpush.bf16.msra.mxu0 %v1747_v20  ;;  %v1746_v22 = vld [vmem:[#allocation6 + $0x8] sm:$0xff]  ;;  %v1784_v20 = vld [vmem:[#allocation7 + $0x78] sm:$0xff] }
  0xb9   :  { %v253_v49 = vpop.f32.mrf.mxu2  ;;  %613 = vmatmul.bf16.vlgmr.msrb.gmra.mxu2 %v345_v47 }
  0xba   :  { %v266_v50 = vpop.f32.mrf.mxu3  ;;  %446 = vmatmul.bf16.gmra.mxu0 %v365_v48  ;;  %1101 = vmatpush.bf16.msra.mxu2 %v1784_v20 }
  0xbb   :  { %943 = vmatpush.bf16.msrb.mxu1 %v1764_v15  ;;  %773 = vmatpush.bf16.msrb.mxu3 %v1754_v27  ;;  %v1791_v27 = vld [vmem:[#allocation7 + $0xb0] sm:$0xff] }
  0xbc   :  { %850 = vmatpush.bf16.msra.mxu0 %v1746_v22  ;;  %v1792_v22 = vld [vmem:[#allocation7 + $0xb8] sm:$0xff] }
  0xbf   :  { %944 = vmatpush.bf16.msrb.mxu1 %v1763_v23  ;;  %774 = vmatpush.bf16.msrb.mxu3 %v1753_v29  ;;  %v1783_v23 = vld [vmem:[#allocation7 + $0x70] sm:$0xff] }
  0xc0   :  { %1102 = vmatpush.bf16.msra.mxu2 %v1783_v23 }
  0xc1   :  { %v303_v53 = vpop.f32.mrf.mxu2 }
  0xc2   :  { %v304_v54 = vadd.f32 %v303_v53, %v122_v51  ;;  %v316_v55 = vpop.f32.mrf.mxu3 }
  0xc3   :  { %v317_v56 = vadd.f32 %v316_v55, %v123_v52  ;;  %945 = vmatpush.bf16.msrb.mxu1 %v1762_v28  ;;  %1178 = vmatpush.bf16.msra.mxu3 %v1776_v21 }
  0xc4   :  { %v334_v57 = vmul.f32 0.2, %v304_v54  ;;  %vm326_vm7 = vcmp.gt.f32.partialorder %v304_v54, 0.0 }
  0xc5   :  { %v335_v58 = vmul.f32 0.2, %v317_v56  ;;  %vm327_vm8 = vcmp.gt.f32.partialorder %v317_v56, 0.0 }
  0xc6   :  { %v342_v59 = vsel %vm326_vm7, %v304_v54, %v334_v57 }
  0xc7   :  { %v343_v60 = vsel %vm327_vm8, %v317_v56, %v335_v58  ;;  %v347_v1 = vpack.c.bf16 %v342_v59, %v341_v25  ;;  %v1745_v25 = vld [vmem:[#allocation6] sm:$0xff]  ;;  %946 = vmatpush.bf16.msrb.mxu1 %v1761_v32  ;;  %1179 = vmatpush.bf16.msra.mxu3 %v1775_v24 }
  0xc8   :  { %v367_v62 = vpack.c.bf16 %v343_v60, %v342_v59  ;;  %v539_v4 = vpack.c.bf16 0.0, %v343_v60  ;;  %851 = vmatpush.bf16.msra.mxu0 %v1745_v25 }
  0xc9   :  { %v305_v63 = vpop.f32.mrf.mxu2  ;;  %618 = vmatmul.bf16.gmra.mxu2 %v346_v61 }
  0xca   :  { %v318_v0 = vpop.f32.mrf.mxu3  ;;  %456 = vmatmul.bf16.gmra.mxu1 %v367_v62 }
  0xcc   :  { %1273 = vmatpush.bf16.msrb.mxu0 %v1792_v22 }
  0xd0   :  { %1274 = vmatpush.bf16.msrb.mxu0 %v1791_v27 }
  0xd9   :  { %623 = vmatmul.bf16.gmra.mxu2 %v347_v1 }
  0xda   :  { %518 = vmatmul.bf16.vlgmr.msra.gmra.mxu1 %v344_v3 }
  0xe9   :  { %628 = vmatmul.bf16.gmra.mxu2 %v539_v4 }
  0xea   :  { %523 = vmatmul.bf16.gmra.mxu1 %v345_v47 }
  0xfa   :  { %528 = vmatmul.bf16.gmra.mxu1 %v346_v61 }
 0x10a   :  { %533 = vmatmul.bf16.gmra.mxu1 %v347_v1 }
 0x127   :  { %v2037_v18 = vpop.f32.mrf.mxu1  ;;  %v442_v34 = vpop.f32.mrf.mxu0 }
 0x12f   :  { %v2039_v26 = vpop.f32.mrf.mxu1  ;;  %v444_v40 = vpop.f32.mrf.mxu0 }
 0x137   :  { %v447_v50 = vpop.f32.mrf.mxu0 }
 0x13c   :  { %v614_v31 = vpop.f32.mrf.mxu2 }
 0x13f   :  { %v449_v60 = vpop.f32.mrf.mxu0 }
 0x144   :  { %v616_v35 = vpop.f32.mrf.mxu2 }
 0x147   :  { %v2041_v30 = vpop.f32.mrf.mxu1 }
 0x14c   :  { %v619_v43 = vpop.f32.mrf.mxu2 }
 0x14f   :  { %v2043_v33 = vpop.f32.mrf.mxu1 }
 0x154   :  { %v621_v55 = vpop.f32.mrf.mxu2 }
 0x157   :  { %v519_v36 = vpop.f32.mrf.mxu1 }
 0x158   :  { %v520_v37 = vadd.f32 %v519_v36, %v442_v34  ;;  %v1782_v34 = vld [vmem:[#allocation7 + $0x68] sm:$0xff] }
 0x159   :  { %1103 = vmatpush.bf16.msra.mxu2 %v1782_v34 }
 0x15a   :  { %v634_v39 = vadd.f32 %v614_v31, %v520_v37  ;;  %v1790_v37 = vld [vmem:[#allocation7 + $0xa8] sm:$0xff] }
 0x15b   :  { %1275 = vmatpush.bf16.msrb.mxu0 %v1790_v37 }
 0x15c   :  { %v646_v41 = vadd.f32 %v2048_v38, %v634_v39  ;;  %v624_v3 = vpop.f32.mrf.mxu2 }
 0x15e   :  { %vm654_vm9 = vcmp.gt.f32.partialorder %v646_v41, 0.0  ;;  %v662_v42 = vmul.f32 0.2, %v646_v41 }
 0x15f   :  { %v521_v44 = vpop.f32.mrf.mxu1 }
 0x160   :  { %v522_v45 = vadd.f32 %v521_v44, %v444_v40  ;;  %v670_v46 = vsel %vm654_vm9, %v646_v41, %v662_v42  ;;  %v1781_v40 = vld [vmem:[#allocation7 + $0x60] sm:$0xff] }
 0x161   :  { %v678_v47 = vpack.c.bf16 %v670_v46, %v1939_v2  ;;  %v1773_v41 = vld [vmem:[#allocation7 + $0x20] sm:$0xff]  ;;  %1104 = vmatpush.bf16.msra.mxu2 %v1781_v40 }
 0x162   :  { %v635_v48 = vadd.f32 %v616_v35, %v522_v45  ;;  %v1774_v35 = vld [vmem:[#allocation7 + $0x28] sm:$0xff] }
 0x163   :  { %852 = vmatmul.bf16.vlgmr.msra.gmra.mxu0 %v678_v47  ;;  %1180 = vmatpush.bf16.msra.mxu3 %v1774_v35 }
 0x164   :  { %v647_v49 = vadd.f32 %v2048_v38, %v635_v48  ;;  %v626_v12 = vpop.f32.mrf.mxu2 }
 0x166   :  { %vm655_vm10 = vcmp.gt.f32.partialorder %v647_v49, 0.0  ;;  %v663_v51 = vmul.f32 0.2, %v647_v49 }
 0x167   :  { %v524_v52 = vpop.f32.mrf.mxu1  ;;  %1181 = vmatpush.bf16.msra.mxu3 %v1773_v41 }
 0x168   :  { %v525_v53 = vadd.f32 %v524_v52, %v447_v50  ;;  %v671_v54 = vsel %vm655_vm10, %v647_v49, %v663_v51 }
 0x169   :  { %v698_v56 = vpack.c.bf16 %v671_v54, %v670_v46 }
 0x16a   :  { %v636_v57 = vadd.f32 %v619_v43, %v525_v53  ;;  %v1780_v53 = vld [vmem:[#allocation7 + $0x58] sm:$0xff] }
 0x16b   :  { %775 = vmatmul.bf16.vlgmr.msrb.gmra.mxu3 %v698_v56  ;;  %1105 = vmatpush.bf16.msra.mxu2 %v1780_v53  ;;  %v1771_v56 = vld [vmem:[#allocation7 + $0x10] sm:$0xff] }
 0x16c   :  { %v648_v58 = vadd.f32 %v2048_v38, %v636_v57  ;;  %v629_v28 = vpop.f32.mrf.mxu2  ;;  %v1788_v57 = vld [vmem:[#allocation7 + $0x98] sm:$0xff] }
 0x16e   :  { %vm656_vm11 = vcmp.gt.f32.partialorder %v648_v58, 0.0  ;;  %v664_v59 = vmul.f32 0.2, %v648_v58 }
 0x16f   :  { %v526_v61 = vpop.f32.mrf.mxu1 }
 0x170   :  { %v527_v62 = vadd.f32 %v526_v61, %v449_v60  ;;  %v672_v63 = vsel %vm656_vm11, %v648_v58, %v664_v59  ;;  %v1769_v58 = vld [vmem:[#allocation7] sm:$0xff]  ;;  %v1778_v59 = vld [vmem:[#allocation7 + $0x48] sm:$0xff]  ;;  %v1787_v60 = vld [vmem:[#allocation7 + $0x90] sm:$0xff] }
 0x171   :  { %v679_v0 = vpack.c.bf16 %v672_v63, %v671_v54  ;;  %v1772_v54 = vld [vmem:[#allocation7 + $0x18] sm:$0xff]  ;;  %v1777_v61 = vld [vmem:[#allocation7 + $0x40] sm:$0xff] }
 0x172   :  { %v637_v1 = vadd.f32 %v621_v55, %v527_v62  ;;  %1182 = vmatpush.bf16.msra.mxu3 %v1772_v54  ;;  %v1779_v55 = vld [vmem:[#allocation7 + $0x50] sm:$0xff]  ;;  %v1786_v62 = vld [vmem:[#allocation7 + $0x88] sm:$0xff] }
 0x173   :  { %857 = vmatmul.bf16.gmra.mxu0 %v679_v0  ;;  %947 = vmatmul.bf16.vlgmr.msrb.gmra.mxu1 %v679_v0  ;;  %v1785_v0 = vld [vmem:[#allocation7 + $0x80] sm:$0xff] }
 0x174   :  { %v649_v4 = vadd.f32 %v2048_v38, %v637_v1  ;;  %v631_v45 = vpop.f32.mrf.mxu2  ;;  %1106 = vmatpush.bf16.msra.mxu2 %v1779_v55 }
 0x176   :  { %vm657_vm12 = vcmp.gt.f32.partialorder %v649_v4, 0.0  ;;  %v665_v5 = vmul.f32 0.2, %v649_v4  ;;  %1183 = vmatpush.bf16.msra.mxu3 %v1771_v56 }
 0x177   :  { %v529_v6 = vpop.f32.mrf.mxu1 }
 0x178   :  { %v530_v7 = vadd.f32 %v529_v6, %v2037_v18  ;;  %v673_v8 = vsel %vm657_vm12, %v649_v4, %v665_v5  ;;  %1107 = vmatpush.bf16.msra.mxu2 %v1778_v59  ;;  %v2066_v5 = vld [vmem:[%s2120_s6] ss:$0 sm:$0xff] }
 0x179   :  { %v699_v9 = vpack.c.bf16 %v673_v8, %v672_v63 }
 0x17a   :  { %v638_v10 = vadd.f32 %v624_v3, %v530_v7 }
 0x17b   :  { %780 = vmatmul.bf16.gmra.mxu3 %v699_v9 }
 0x17c   :  { %v650_v11 = vadd.f32 %v2048_v38, %v638_v10  ;;  %1108 = vmatpush.bf16.msra.mxu2 %v1777_v61 }
 0x17e   :  { %vm658_vm13 = vcmp.gt.f32.partialorder %v650_v11, 0.0  ;;  %v666_v13 = vmul.f32 0.2, %v650_v11 }
 0x17f   :  { %v531_v14 = vpop.f32.mrf.mxu1 }
 0x180   :  { %v532_v15 = vadd.f32 %v531_v14, %v2039_v26  ;;  %v674_v16 = vsel %vm658_vm13, %v650_v11, %v666_v13 }
 0x181   :  { %v680_v17 = vpack.c.bf16 %v674_v16, %v673_v8 }
 0x182   :  { %v639_v19 = vadd.f32 %v626_v12, %v532_v15 }
 0x183   :  { %862 = vmatmul.bf16.gmra.mxu0 %v680_v17  ;;  %952 = vmatmul.bf16.gmra.mxu1 %v680_v17 }
 0x184   :  { %v651_v18 = vadd.f32 %v2048_v38, %v639_v19 }
 0x186   :  { %vm659_vm14 = vcmp.gt.f32.partialorder %v651_v18, 0.0  ;;  %v667_v25 = vmul.f32 0.2, %v651_v18 }
 0x187   :  { %v534_v26 = vpop.f32.mrf.mxu1 }
 0x188   :  { %v535_v29 = vadd.f32 %v534_v26, %v2041_v30  ;;  %v675_v31 = vsel %vm659_vm14, %v651_v18, %v667_v25 }
 0x189   :  { %v700_v32 = vpack.c.bf16 %v675_v31, %v674_v16 }
 0x18a   :  { %v640_v36 = vadd.f32 %v629_v28, %v535_v29 }
 0x18b   :  { %785 = vmatmul.bf16.gmra.mxu3 %v700_v32 }
 0x18c   :  { %v652_v39 = vadd.f32 %v2048_v38, %v640_v36 }
 0x18e   :  { %vm660_vm15 = vcmp.gt.f32.partialorder %v652_v39, 0.0  ;;  %v668_v42 = vmul.f32 0.2, %v652_v39 }
 0x18f   :  { %v536_v30 = vpop.f32.mrf.mxu1 }
 0x190   :  { %v537_v43 = vadd.f32 %v536_v30, %v2043_v33  ;;  %v676_v44 = vsel %vm660_vm15, %v652_v39, %v668_v42  ;;  %v1789_v33 = vld [vmem:[#allocation7 + $0xa0] sm:$0xff] }
 0x191   :  { %v681_v46 = vpack.c.bf16 %v676_v44, %v675_v31  ;;  %1276 = vmatpush.bf16.msrb.mxu0 %v1789_v33 }
 0x192   :  { %v641_v47 = vadd.f32 %v631_v45, %v537_v43 }
 0x193   :  { %867 = vmatmul.bf16.gmra.mxu0 %v681_v46  ;;  %957 = vmatmul.bf16.gmra.mxu1 %v681_v46 }
 0x194   :  { %v653_v48 = vadd.f32 %v2048_v38, %v641_v47  ;;  %v1770_v38 = vld [vmem:[#allocation7 + $0x8] sm:$0xff] }
 0x195   :  { %1277 = vmatpush.bf16.msrb.mxu0 %v1788_v57  ;;  %1184 = vmatpush.bf16.msra.mxu3 %v1770_v38 }
 0x196   :  { %vm661_vm0 = vcmp.gt.f32.partialorder %v653_v48, 0.0  ;;  %v669_v49 = vmul.f32 0.2, %v653_v48 }
 0x198   :  { %v677_v50 = vsel %vm661_vm0, %v653_v48, %v669_v49 }
 0x199   :  { %v701_v51 = vpack.c.bf16 %v677_v50, %v676_v44  ;;  %v873_v52 = vpack.c.bf16 0.0, %v677_v50  ;;  %1185 = vmatpush.bf16.msra.mxu3 %v1769_v58  ;;  %1278 = vmatpush.bf16.msrb.mxu0 %v1787_v60 }
 0x19b   :  { %790 = vmatmul.bf16.gmra.mxu3 %v701_v51 }
 0x19d   :  { %1279 = vmatpush.bf16.msrb.mxu0 %v1786_v62 }
 0x1a1   :  { %1280 = vmatpush.bf16.msrb.mxu0 %v1785_v0 }
 0x1a3   :  { %962 = vmatmul.bf16.gmra.mxu1 %v873_v52 }
 0x1e0   :  { %v853_v63 = vpop.f32.mrf.mxu0 }
 0x1e8   :  { %v855_v1 = vpop.f32.mrf.mxu0 }
 0x1ee   :  { %v776_v3 = vpop.f32.mrf.mxu3 }
 0x1ef   :  { %v854_v4 = vadd.f32 %v853_v63, %v776_v3 }
 0x1f0   :  { %v948_v6 = vpop.f32.mrf.mxu1  ;;  %v858_v9 = vpop.f32.mrf.mxu0 }
 0x1f1   :  { %v968_v7 = vadd.f32 %v948_v6, %v854_v4 }
 0x1f3   :  { %v980_v8 = vadd.f32 %v2066_v5, %v968_v7 }
 0x1f5   :  { %vm988_vm1 = vcmp.gt.f32.partialorder %v980_v8, 0.0  ;;  %v996_v10 = vmul.f32 0.2, %v980_v8 }
 0x1f6   :  { %v778_v11 = vpop.f32.mrf.mxu3 }
 0x1f7   :  { %v1004_v12 = vsel %vm988_vm1, %v980_v8, %v996_v10  ;;  %v856_v13 = vadd.f32 %v855_v1, %v778_v11 }
 0x1f8   :  { %v950_v14 = vpop.f32.mrf.mxu1  ;;  %v1012_v15 = vpack.c.bf16 %v1004_v12, %v1939_v2  ;;  %v860_v20 = vpop.f32.mrf.mxu0 }
 0x1f9   :  { %v969_v16 = vadd.f32 %v950_v14, %v856_v13 }
 0x1fa   :  { %1186 = vmatmul.bf16.vlgmr.msra.gmra.mxu3 %v1012_v15 }
 0x1fb   :  { %v981_v17 = vadd.f32 %v2066_v5, %v969_v16  ;;  %v2080_v16 = vld [vmem:[%s2122_s8] ss:$0 sm:$0xff] }
 0x1fd   :  { %vm989_vm2 = vcmp.gt.f32.partialorder %v981_v17, 0.0  ;;  %v997_v19 = vmul.f32 0.2, %v981_v17 }
 0x1fe   :  { %v781_v21 = vpop.f32.mrf.mxu3 }
 0x1ff   :  { %v1005_v18 = vsel %vm989_vm2, %v981_v17, %v997_v19  ;;  %v859_v22 = vadd.f32 %v858_v9, %v781_v21 }
 0x200   :  { %v953_v23 = vpop.f32.mrf.mxu1  ;;  %v1032_v24 = vpack.c.bf16 %v1005_v18, %v1004_v12  ;;  %v863_v31 = vpop.f32.mrf.mxu0 }
 0x201   :  { %v970_v25 = vadd.f32 %v953_v23, %v859_v22 }
 0x202   :  { %1109 = vmatmul.bf16.vlgmr.msra.gmra.mxu2 %v1032_v24 }
 0x203   :  { %v982_v27 = vadd.f32 %v2066_v5, %v970_v25 }
 0x205   :  { %vm990_vm3 = vcmp.gt.f32.partialorder %v982_v27, 0.0  ;;  %v998_v28 = vmul.f32 0.2, %v982_v27 }
 0x206   :  { %v783_v26 = vpop.f32.mrf.mxu3 }
 0x207   :  { %v861_v2 = vadd.f32 %v860_v20, %v783_v26  ;;  %v1006_v29 = vsel %vm990_vm3, %v982_v27, %v998_v28 }
 0x208   :  { %v955_v32 = vpop.f32.mrf.mxu1  ;;  %v1013_v34 = vpack.c.bf16 %v1006_v29, %v1005_v18  ;;  %v865_v44 = vpop.f32.mrf.mxu0 }
 0x209   :  { %v971_v35 = vadd.f32 %v955_v32, %v861_v2 }
 0x20a   :  { %1191 = vmatmul.bf16.gmra.mxu3 %v1013_v34  ;;  %1281 = vmatmul.bf16.vlgmr.msrb.gmra.mxu0 %v1013_v34 }
 0x20b   :  { %v983_v36 = vadd.f32 %v2066_v5, %v971_v35 }
 0x20d   :  { %vm991_vm4 = vcmp.gt.f32.partialorder %v983_v36, 0.0  ;;  %v999_v37 = vmul.f32 0.2, %v983_v36 }
 0x20e   :  { %v786_v39 = vpop.f32.mrf.mxu3 }
 0x20f   :  { %v864_v40 = vadd.f32 %v863_v31, %v786_v39  ;;  %v1007_v41 = vsel %vm991_vm4, %v983_v36, %v999_v37 }
 0x210   :  { %v958_v42 = vpop.f32.mrf.mxu1  ;;  %v1033_v30 = vpack.c.bf16 %v1007_v41, %v1006_v29  ;;  %v868_v54 = vpop.f32.mrf.mxu0 }
 0x211   :  { %v972_v43 = vadd.f32 %v958_v42, %v864_v40 }
 0x212   :  { %1114 = vmatmul.bf16.gmra.mxu2 %v1033_v30 }
 0x213   :  { %v984_v45 = vadd.f32 %v2066_v5, %v972_v43 }
 0x215   :  { %vm992_vm5 = vcmp.gt.f32.partialorder %v984_v45, 0.0  ;;  %v1000_v46 = vmul.f32 0.2, %v984_v45 }
 0x216   :  { %v788_v47 = vpop.f32.mrf.mxu3 }
 0x217   :  { %v866_v48 = vadd.f32 %v865_v44, %v788_v47  ;;  %v1008_v49 = vsel %vm992_vm5, %v984_v45, %v1000_v46 }
 0x218   :  { %v960_v50 = vpop.f32.mrf.mxu1  ;;  %v1014_v51 = vpack.c.bf16 %v1008_v49, %v1007_v41  ;;  %v870_v62 = vpop.f32.mrf.mxu0 }
 0x219   :  { %v973_v52 = vadd.f32 %v960_v50, %v866_v48 }
 0x21a   :  { %1196 = vmatmul.bf16.gmra.mxu3 %v1014_v51  ;;  %1286 = vmatmul.bf16.gmra.mxu0 %v1014_v51 }
 0x21b   :  { %v985_v53 = vadd.f32 %v2066_v5, %v973_v52 }
 0x21d   :  { %vm993_vm6 = vcmp.gt.f32.partialorder %v985_v53, 0.0  ;;  %v1001_v33 = vmul.f32 0.2, %v985_v53 }
 0x21e   :  { %v791_v55 = vpop.f32.mrf.mxu3 }
 0x21f   :  { %v869_v56 = vadd.f32 %v868_v54, %v791_v55  ;;  %v1009_v57 = vsel %vm993_vm6, %v985_v53, %v1001_v33 }
 0x220   :  { %v963_v38 = vpop.f32.mrf.mxu1  ;;  %v1034_v58 = vpack.c.bf16 %v1009_v57, %v1008_v49 }
 0x221   :  { %v974_v59 = vadd.f32 %v963_v38, %v869_v56 }
 0x222   :  { %1119 = vmatmul.bf16.gmra.mxu2 %v1034_v58 }
 0x223   :  { %v986_v60 = vadd.f32 %v2066_v5, %v974_v59 }
 0x225   :  { %vm994_vm7 = vcmp.gt.f32.partialorder %v986_v60, 0.0  ;;  %v1002_v61 = vmul.f32 0.2, %v986_v60 }
 0x226   :  { %v793_v63 = vpop.f32.mrf.mxu3 }
 0x227   :  { %v871_v0 = vadd.f32 %v870_v62, %v793_v63  ;;  %v1010_v1 = vsel %vm994_vm7, %v986_v60, %v1002_v61 }
 0x228   :  { %v965_v3 = vpop.f32.mrf.mxu1  ;;  %v1015_v4 = vpack.c.bf16 %v1010_v1, %v1009_v57 }
 0x229   :  { %v975_v6 = vadd.f32 %v965_v3, %v871_v0 }
 0x22a   :  { %1201 = vmatmul.bf16.gmra.mxu3 %v1015_v4  ;;  %1291 = vmatmul.bf16.gmra.mxu0 %v1015_v4 }
 0x22b   :  { %v987_v7 = vadd.f32 %v2066_v5, %v975_v6 }
 0x22d   :  { %vm995_vm8 = vcmp.gt.f32.partialorder %v987_v7, 0.0  ;;  %v1003_v8 = vmul.f32 0.2, %v987_v7 }
 0x22f   :  { %v1011_v9 = vsel %vm995_vm8, %v987_v7, %v1003_v8 }
 0x230   :  { %v1035_v10 = vpack.c.bf16 %v1011_v9, %v1010_v1  ;;  %v1207_v11 = vpack.c.bf16 0.0, %v1011_v9 }
 0x232   :  { %1124 = vmatmul.bf16.gmra.mxu2 %v1035_v10 }
 0x23a   :  { %1296 = vmatmul.bf16.gmra.mxu0 %v1207_v11 }
 0x27d   :  { %v1187_v12 = vpop.f32.mrf.mxu3 }
 0x285   :  { %v1110_v13 = vpop.f32.mrf.mxu2  ;;  %v1189_v14 = vpop.f32.mrf.mxu3 }
 0x286   :  { %v1188_v15 = vadd.f32 %v1187_v12, %v1110_v13 }
 0x287   :  { %v1282_v17 = vpop.f32.mrf.mxu0 }
 0x288   :  { %v1302_v19 = vadd.f32 %v1282_v17, %v1188_v15 }
 0x28a   :  { %v1314_v5 = vadd.f32 %v2080_v16, %v1302_v19 }
 0x28c   :  { %1813 = vtanh.f32 %v1314_v5 }
 0x28d   :  { %v1112_v20 = vpop.f32.mrf.mxu2  ;;  %v1192_v21 = vpop.f32.mrf.mxu3 }
 0x28e   :  { %v1190_v18 = vadd.f32 %v1189_v14, %v1112_v20 }
 0x28f   :  { %v1284_v22 = vpop.f32.mrf.mxu0 }
 0x290   :  { %v1303_v23 = vadd.f32 %v1284_v22, %v1190_v18 }
 0x292   :  { %v1814_v24 = vpop.eup %1813  ;;  %v1315_v25 = vadd.f32 %v2080_v16, %v1303_v23 }
 0x293   :  { %1330 = vst [vmem:[%s2123_s9] sm:$0xff] %v1814_v24 }
 0x294   :  { %1815 = vtanh.f32 %v1315_v25 }
 0x295   :  { %v1115_v27 = vpop.f32.mrf.mxu2  ;;  %v1194_v28 = vpop.f32.mrf.mxu3 }
 0x296   :  { %v1193_v26 = vadd.f32 %v1192_v21, %v1115_v27 }
 0x297   :  { %v1287_v2 = vpop.f32.mrf.mxu0 }
 0x298   :  { %v1304_v29 = vadd.f32 %v1287_v2, %v1193_v26 }
 0x29a   :  { %v1816_v31 = vpop.eup %1815  ;;  %v1316_v32 = vadd.f32 %v2080_v16, %v1304_v29 }
 0x29b   :  { %1331 = vst [vmem:[%s2123_s9 + $0x8] sm:$0xff] %v1816_v31 }
 0x29c   :  { %1817 = vtanh.f32 %v1316_v32 }
 0x29d   :  { %v1117_v34 = vpop.f32.mrf.mxu2  ;;  %v1197_v36 = vpop.f32.mrf.mxu3 }
 0x29e   :  { %v1195_v35 = vadd.f32 %v1194_v28, %v1117_v34 }
 0x29f   :  { %v1289_v37 = vpop.f32.mrf.mxu0 }
 0x2a0   :  { %v1305_v39 = vadd.f32 %v1289_v37, %v1195_v35 }
 0x2a2   :  { %v1818_v40 = vpop.eup %1817  ;;  %v1317_v41 = vadd.f32 %v2080_v16, %v1305_v39 }
 0x2a3   :  { %1332 = vst [vmem:[%s2123_s9 + $0x10] sm:$0xff] %v1818_v40 }
 0x2a4   :  { %1819 = vtanh.f32 %v1317_v41 }
 0x2a5   :  { %v1120_v42 = vpop.f32.mrf.mxu2  ;;  %v1199_v45 = vpop.f32.mrf.mxu3 }
 0x2a6   :  { %v1198_v30 = vadd.f32 %v1197_v36, %v1120_v42 }
 0x2a7   :  { %v1292_v43 = vpop.f32.mrf.mxu0 }
 0x2a8   :  { %v1306_v44 = vadd.f32 %v1292_v43, %v1198_v30 }
 0x2aa   :  { %v1820_v46 = vpop.eup %1819  ;;  %v1318_v47 = vadd.f32 %v2080_v16, %v1306_v44 }
 0x2ab   :  { %1333 = vst [vmem:[%s2123_s9 + $0x18] sm:$0xff] %v1820_v46 }
 0x2ac   :  { %1821 = vtanh.f32 %v1318_v47 }
 0x2ad   :  { %v1122_v48 = vpop.f32.mrf.mxu2  ;;  %v1202_v54 = vpop.f32.mrf.mxu3 }
 0x2ae   :  { %v1200_v49 = vadd.f32 %v1199_v45, %v1122_v48 }
 0x2af   :  { %v1294_v50 = vpop.f32.mrf.mxu0 }
 0x2b0   :  { %v1307_v51 = vadd.f32 %v1294_v50, %v1200_v49 }
 0x2b2   :  { %v1822_v52 = vpop.eup %1821  ;;  %v1319_v53 = vadd.f32 %v2080_v16, %v1307_v51 }
 0x2b3   :  { %1334 = vst [vmem:[%s2123_s9 + $0x20] sm:$0xff] %v1822_v52 }
 0x2b4   :  { %1823 = vtanh.f32 %v1319_v53 }
 0x2b5   :  { %v1125_v33 = vpop.f32.mrf.mxu2  ;;  %v1204_v59 = vpop.f32.mrf.mxu3 }
 0x2b6   :  { %v1203_v55 = vadd.f32 %v1202_v54, %v1125_v33 }
 0x2b7   :  { %v1297_v56 = vpop.f32.mrf.mxu0 }
 0x2b8   :  { %v1308_v57 = vadd.f32 %v1297_v56, %v1203_v55 }
 0x2ba   :  { %v1824_v38 = vpop.eup %1823  ;;  %v1320_v58 = vadd.f32 %v2080_v16, %v1308_v57 }
 0x2bb   :  { %1335 = vst [vmem:[%s2123_s9 + $0x28] sm:$0xff] %v1824_v38 }
 0x2bc   :  { %1825 = vtanh.f32 %v1320_v58 }
 0x2bd   :  { %v1127_v60 = vpop.f32.mrf.mxu2 }
 0x2be   :  { %v1205_v61 = vadd.f32 %v1204_v59, %v1127_v60 }
 0x2bf   :  { %v1299_v62 = vpop.f32.mrf.mxu0 }
 0x2c0   :  { %v1309_v63 = vadd.f32 %v1299_v62, %v1205_v61 }
 0x2c2   :  { %v1826_v0 = vpop.eup %1825  ;;  %v1321_v1 = vadd.f32 %v2080_v16, %v1309_v63 }
 0x2c3   :  { %1336 = vst [vmem:[%s2123_s9 + $0x30] sm:$0xff] %v1826_v0 }
 0x2c4   :  { %1827 = vtanh.f32 %v1321_v1 }
 0x2ca   :  { %v1828_v3 = vpop.eup %1827 }
 0x2cb   :  { %1337 = vst [vmem:[%s2123_s9 + $0x38] sm:$0xff] %v1828_v3 }
 0x2cc   :  { %1342 = vsyncpa [#allocation3], 1 }
 0x2cd   :  { %1343 = vsyncpa [#allocation5], 1 }
 0x2ce   :  { %1344 = vsyncpa [#allocation8], 1 }

</bundles_post_ra>
